<compile_context>
chip_gen: v5e
topology: v5e:2x2
jax: 0.10.0
libtpu: 0.0.40
codegen_flags: <defaults>
</compile_context>

<pallas_src>
import functools
import math

import jax
import jax.numpy as jnp
from jax.experimental import pallas as pl
from jax.experimental.pallas import tpu as pltpu


def _layer_norm(x, gamma, beta, eps=1e-5):
    mu = jnp.mean(x, axis=-1, keepdims=True)
    var = jnp.mean((x - mu) ** 2, axis=-1, keepdims=True)
    return (x - mu) * jax.lax.rsqrt(var + eps) * gamma + beta


def encoder_layer_kernel(
    q_ref, k_ref, v_ref,          # (NB, L, E), (NB, S, E), (NB, S, E) f32
    wq_ref, wk_ref, wv_ref,       # (E, E) bf16 (scale folded into wq)
    wo_ref,                       # (E, E) bf16
    vec_ref,                      # (9, E) f32: bq*s, bk, bv, bo, b2, g1, be1, g2, be2
    w1_ref, b1_ref, w2_ref,       # (E, F) bf16, (1, F) f32, (F, E) bf16
    out_ref,                      # (NB, L, E) f32
    *, nhead,
):
    NB, L, E = q_ref.shape
    S = k_ref.shape[1]
    hd = E // nhead
    cdt = wq_ref.dtype            # MXU compute dtype (bf16)

    # Flatten token rows: (NB, L, E) -> (NB*L, E).  Free when L % 8 == 0.
    q2 = q_ref[...].reshape(NB * L, E)
    k2 = k_ref[...].reshape(NB * S, E)
    v2 = v_ref[...].reshape(NB * S, E)              # f32; also the residual input

    bq = vec_ref[0:1]; bk = vec_ref[1:2]; bv = vec_ref[2:3]
    bo = vec_ref[3:4]; b2 = vec_ref[4:5]
    g1 = vec_ref[5:6]; be1 = vec_ref[6:7]
    g2 = vec_ref[7:8]; be2 = vec_ref[8:9]

    # --- fused (all-head) in-projections: wide MXU matmuls, f32 accumulate ---
    Q = jnp.dot(q2.astype(cdt), wq_ref[...], preferred_element_type=jnp.float32) + bq
    K = jnp.dot(k2.astype(cdt), wk_ref[...], preferred_element_type=jnp.float32) + bk
    V = jnp.dot(v2.astype(cdt), wv_ref[...], preferred_element_type=jnp.float32) + bv

    # --- scaled dot-product attention per head (static unrolled loop, H small) ---
    head_outs = []
    for h in range(nhead):
        lo, hi = h * hd, (h + 1) * hd
        Qh = Q[:, lo:hi].reshape(NB, L, hd)
        Kh = K[:, lo:hi].reshape(NB, S, hd)
        Vh = V[:, lo:hi].reshape(NB, S, hd)
        s = jnp.einsum('bld,bsd->bls', Qh, Kh, preferred_element_type=jnp.float32)
        s = s - jnp.max(s, axis=-1, keepdims=True)
        p = jnp.exp(s)
        p = p * pl.reciprocal(jnp.sum(p, axis=-1, keepdims=True), approx=True)
        ah = jnp.einsum('bls,bsd->bld', p, Vh, preferred_element_type=jnp.float32)
        head_outs.append(ah.reshape(NB * L, hd))

    attn = jnp.concatenate(head_outs, axis=-1)      # (NB*L, E), head order matches Wo rows

    # --- single out-projection, residual + LN1, FFN, residual + LN2 ---
    src2 = jnp.dot(attn.astype(cdt), wo_ref[...], preferred_element_type=jnp.float32) + bo
    src = _layer_norm(v2 + src2, g1, be1)           # residual uses original src (== V input)

    h1 = jnp.dot(src.astype(cdt), w1_ref[...], preferred_element_type=jnp.float32) + b1_ref[...]
    h1 = jnp.maximum(h1, 0.0)                       # ReLU
    ff = jnp.dot(h1.astype(cdt), w2_ref[...], preferred_element_type=jnp.float32) + b2

    out = _layer_norm(src + ff, g2, be2)
    out_ref[...] = out.reshape(NB, L, E).astype(out_ref.dtype)


def _pick_batch_block(N, L, target_rows=1024):
    """Largest divisor of N whose slab stays <= target_rows token rows while
    keeping >= 2 grid steps when N allows (so v7x's 2 TensorCores both work)."""
    divs = [d for d in range(1, N + 1) if N % d == 0]
    cands = [d for d in divs if d * L <= target_rows and (N // d) >= 2]
    if not cands:
        cands = [d for d in divs if d * L <= target_rows]
    if not cands:
        cands = [1]
    return max(cands)


def _vmem_limit_bytes(NB, L, S, E, F):
    """Actual working-set estimate with headroom, capped well under a v7x core."""
    f32, bf16 = 4, 2
    slabs = 2 * (NB * L * E + 2 * NB * S * E + NB * L * E) * f32       # double-buffered I/O
    weights = 2 * ((4 * E * E + E * F + F * E) * bf16 + (9 * E + F) * f32)
    est = 4 * (slabs + weights) + (8 << 20)                            # intermediates / scratch
    return int(min(48 << 20, max(16 << 20, est)))


def transformer_encoder_layer_qkv(query, key, src, kparams, *, nhead,
                                  batch_block=None):
    """query/key/src: (L, N, E) seq-first (PyTorch convention). Returns (L, N, E)."""
    L, N, E = query.shape
    S = key.shape[0]
    assert L == S, "residual src + attn_out requires query/key/value lengths to match"
    assert E % nhead == 0
    # TODO(synk): pad L/S to a multiple of 8 for general sequence lengths; the
    # (NB, L, E)->(NB*L, E) reshape is only layout-free when L % 8 == 0.
    assert L % 8 == 0 and S % 8 == 0, "L and S must be multiples of 8 (sublane tile)"
    F = kparams["w1"].shape[1]

    NB = batch_block if batch_block is not None else _pick_batch_block(N, L)
    assert N % NB == 0

    # Batch-first for the kernel.
    q_nle = jnp.transpose(query, (1, 0, 2))
    k_nle = jnp.transpose(key, (1, 0, 2))
    v_nle = jnp.transpose(src, (1, 0, 2))

    def const(shape):
        return pl.BlockSpec(shape, lambda b: tuple(0 for _ in shape))

    tok_L = pl.BlockSpec((NB, L, E), lambda b: (b, 0, 0))
    tok_S = pl.BlockSpec((NB, S, E), lambda b: (b, 0, 0))

    out = pl.pallas_call(
        functools.partial(encoder_layer_kernel, nhead=nhead),
        out_shape=jax.ShapeDtypeStruct((N, L, E), jnp.float32),
        grid_spec=pltpu.PrefetchScalarGridSpec(
            num_scalar_prefetch=0,
            grid=(N // NB,),                       # single parallel batch-tile axis
            in_specs=[
                tok_L, tok_S, tok_S,               # q, k, v
                const((E, E)), const((E, E)), const((E, E)),   # wq, wk, wv
                const((E, E)),                                 # wo
                const((9, E)),                                 # packed biases + LN params
                const((E, F)), const((1, F)), const((F, E)),   # w1, b1, w2
            ],
            out_specs=tok_L,
        ),
        compiler_params=pltpu.CompilerParams(
            dimension_semantics=("parallel",),
            vmem_limit_bytes=_vmem_limit_bytes(NB, L, S, E, F),
        ),
    )(
        q_nle, k_nle, v_nle,
        kparams["wq"], kparams["wk"], kparams["wv"],
        kparams["wo"],
        kparams["vec"],
        kparams["w1"], kparams["b1"], kparams["w2"],
    )
    return jnp.transpose(out, (1, 0, 2))   # back to (L, N, E)


def init_params(key, d_model, nhead, dim_feedforward):
    """Deterministic synthetic parameters in 'logical' layout.

    Weight matrices are stored pre-transposed (in_dim, out_dim) so the kernel
    computes x @ W directly (PyTorch stores (out_dim, in_dim) and does x @ W^T).
    """
    ks = jax.random.split(key, 8)
    s = 0.05
    E, F = d_model, dim_feedforward
    return {
        "wq": s * jax.random.normal(ks[0], (E, E), jnp.float32),
        "wk": s * jax.random.normal(ks[1], (E, E), jnp.float32),
        "wv": s * jax.random.normal(ks[2], (E, E), jnp.float32),
        "bq": jnp.zeros((E,), jnp.float32),
        "bk": jnp.zeros((E,), jnp.float32),
        "bv": jnp.zeros((E,), jnp.float32),
        "wo": s * jax.random.normal(ks[3], (E, E), jnp.float32),
        "bo": s * jax.random.normal(ks[4], (E,), jnp.float32),
        "w1": s * jax.random.normal(ks[5], (E, F), jnp.float32),
        "b1": s * jax.random.normal(ks[6], (F,), jnp.float32),
        "w2": s * jax.random.normal(ks[7], (F, E), jnp.float32),
        "b2": jnp.zeros((E,), jnp.float32),
        "g1": jnp.ones((E,), jnp.float32),
        "be1": jnp.zeros((E,), jnp.float32),
        "g2": jnp.ones((E,), jnp.float32),
        "be2": jnp.zeros((E,), jnp.float32),
    }


def prepare_kernel_params(p, nhead):
    """Host-side prep: 1/sqrt(hd) folding into Wq/bq, bf16 cast for MXU weights,
    packing of all (E,)-sized vectors into one (9, E) buffer."""
    E = p["wq"].shape[0]
    F = p["w1"].shape[1]
    hd = E // nhead
    scale = 1.0 / math.sqrt(hd)
    cdt = jnp.bfloat16

    vec = jnp.stack(
        [p["bq"] * scale, p["bk"], p["bv"], p["bo"], p["b2"],
         p["g1"], p["be1"], p["g2"], p["be2"]], axis=0).astype(jnp.float32)  # (9, E)

    return {
        "wq": (p["wq"] * scale).astype(cdt),   # scale folded into Wq
        "wk": p["wk"].astype(cdt),
        "wv": p["wv"].astype(cdt),
        "wo": p["wo"].astype(cdt),
        "vec": vec,
        "w1": p["w1"].astype(cdt),
        "b1": p["b1"].reshape(1, F).astype(jnp.float32),
        "w2": p["w2"].astype(cdt),
    }


if __name__ == "__main__":
    d_model, nhead, dim_feedforward = 32, 4, 64
    L = S = 8
    N = 2

    root = jax.random.PRNGKey(0)
    k_q, k_k, k_s, k_p = jax.random.split(root, 4)

    # PyTorch MultiheadAttention seq-first layout: (L, N, E)
    query = jax.random.normal(k_q, (L, N, d_model), jnp.float32)
    key = jax.random.normal(k_k, (S, N, d_model), jnp.float32)
    src = jax.random.normal(k_s, (S, N, d_model), jnp.float32)

    params = init_params(k_p, d_model, nhead, dim_feedforward)
    kparams = prepare_kernel_params(params, nhead)

    # TODO(synk): Dropout layers are treated as identity (eval mode); training-mode
    # dropout is not implemented in the kernel.
    out = transformer_encoder_layer_qkv(query, key, src, kparams, nhead=nhead)
    out = jax.block_until_ready(out)
    assert out.shape == (L, N, d_model)
    assert bool(jnp.all(jnp.isfinite(out)))
    print("KERNEL_OK")
</pallas_src>

<mosaic_0001>
module attributes {stable_mosaic.version = 11 : i64} {
  func.func @encoder_layer_kernel(%arg0: i32, %arg1: memref<1x8x32xf32, #tpu.memory_space<vmem>>, %arg2: memref<1x8x32xf32, #tpu.memory_space<vmem>>, %arg3: memref<1x8x32xf32, #tpu.memory_space<vmem>>, %arg4: memref<32x32xbf16, #tpu.memory_space<vmem>>, %arg5: memref<32x32xbf16, #tpu.memory_space<vmem>>, %arg6: memref<32x32xbf16, #tpu.memory_space<vmem>>, %arg7: memref<32x32xbf16, #tpu.memory_space<vmem>>, %arg8: memref<9x32xf32, #tpu.memory_space<vmem>>, %arg9: memref<32x64xbf16, #tpu.memory_space<vmem>>, %arg10: memref<1x64xf32, #tpu.memory_space<vmem>>, %arg11: memref<64x32xbf16, #tpu.memory_space<vmem>>, %arg12: memref<1x8x32xf32, #tpu.memory_space<vmem>>) attributes {dimension_semantics = [#tpu.dimension_semantics<parallel>], iteration_bounds = array<i64: 2>, scalar_prefetch = 0 : i64, scratch_operands = 0 : i64, tpu.core_type = #tpu.core_type<tc>, window_params = [{transform_indices = @transform_0, window_bounds = array<i64: 1, 8, 32>}, {transform_indices = @transform_1, window_bounds = array<i64: 1, 8, 32>}, {transform_indices = @transform_2, window_bounds = array<i64: 1, 8, 32>}, {pipeline_mode = #tpu.pipeline_mode<synchronous>, transform_indices = @transform_3, window_bounds = array<i64: 32, 32>}, {pipeline_mode = #tpu.pipeline_mode<synchronous>, transform_indices = @transform_4, window_bounds = array<i64: 32, 32>}, {pipeline_mode = #tpu.pipeline_mode<synchronous>, transform_indices = @transform_5, window_bounds = array<i64: 32, 32>}, {pipeline_mode = #tpu.pipeline_mode<synchronous>, transform_indices = @transform_6, window_bounds = array<i64: 32, 32>}, {pipeline_mode = #tpu.pipeline_mode<synchronous>, transform_indices = @transform_7, window_bounds = array<i64: 9, 32>}, {pipeline_mode = #tpu.pipeline_mode<synchronous>, transform_indices = @transform_8, window_bounds = array<i64: 32, 64>}, {pipeline_mode = #tpu.pipeline_mode<synchronous>, transform_indices = @transform_9, window_bounds = array<i64: 1, 64>}, {pipeline_mode = #tpu.pipeline_mode<synchronous>, transform_indices = @transform_10, window_bounds = array<i64: 64, 32>}, {transform_indices = @transform_11, window_bounds = array<i64: 1, 8, 32>}]} {
    %c0 = arith.constant 0 : index
    %c0_0 = arith.constant 0 : index
    %c0_1 = arith.constant 0 : index
    %0 = vector.load %arg1[%c0, %c0_0, %c0_1] : memref<1x8x32xf32, #tpu.memory_space<vmem>>, vector<1x8x32xf32>
    %1 = vector.shape_cast %0 : vector<1x8x32xf32> to vector<8x32xf32>
    %c0_2 = arith.constant 0 : index
    %c0_3 = arith.constant 0 : index
    %c0_4 = arith.constant 0 : index
    %2 = vector.load %arg2[%c0_2, %c0_3, %c0_4] : memref<1x8x32xf32, #tpu.memory_space<vmem>>, vector<1x8x32xf32>
    %3 = vector.shape_cast %2 : vector<1x8x32xf32> to vector<8x32xf32>
    %c0_5 = arith.constant 0 : index
    %c0_6 = arith.constant 0 : index
    %c0_7 = arith.constant 0 : index
    %4 = vector.load %arg3[%c0_5, %c0_6, %c0_7] : memref<1x8x32xf32, #tpu.memory_space<vmem>>, vector<1x8x32xf32>
    %5 = vector.shape_cast %4 : vector<1x8x32xf32> to vector<8x32xf32>
    %c0_8 = arith.constant 0 : index
    %c0_9 = arith.constant 0 : index
    %6 = vector.load %arg8[%c0_8, %c0_9] : memref<9x32xf32, #tpu.memory_space<vmem>>, vector<1x32xf32>
    %c1 = arith.constant 1 : index
    %c0_10 = arith.constant 0 : index
    %7 = vector.load %arg8[%c1, %c0_10] : memref<9x32xf32, #tpu.memory_space<vmem>>, vector<1x32xf32>
    %c2 = arith.constant 2 : index
    %c0_11 = arith.constant 0 : index
    %8 = vector.load %arg8[%c2, %c0_11] : memref<9x32xf32, #tpu.memory_space<vmem>>, vector<1x32xf32>
    %c3 = arith.constant 3 : index
    %c0_12 = arith.constant 0 : index
    %9 = vector.load %arg8[%c3, %c0_12] : memref<9x32xf32, #tpu.memory_space<vmem>>, vector<1x32xf32>
    %c4 = arith.constant 4 : index
    %c0_13 = arith.constant 0 : index
    %10 = vector.load %arg8[%c4, %c0_13] : memref<9x32xf32, #tpu.memory_space<vmem>>, vector<1x32xf32>
    %c5 = arith.constant 5 : index
    %c0_14 = arith.constant 0 : index
    %11 = vector.load %arg8[%c5, %c0_14] : memref<9x32xf32, #tpu.memory_space<vmem>>, vector<1x32xf32>
    %c6 = arith.constant 6 : index
    %c0_15 = arith.constant 0 : index
    %12 = vector.load %arg8[%c6, %c0_15] : memref<9x32xf32, #tpu.memory_space<vmem>>, vector<1x32xf32>
    %c7 = arith.constant 7 : index
    %c0_16 = arith.constant 0 : index
    %13 = vector.load %arg8[%c7, %c0_16] : memref<9x32xf32, #tpu.memory_space<vmem>>, vector<1x32xf32>
    %c8 = arith.constant 8 : index
    %c0_17 = arith.constant 0 : index
    %14 = vector.load %arg8[%c8, %c0_17] : memref<9x32xf32, #tpu.memory_space<vmem>>, vector<1x32xf32>
    %15 = arith.truncf %1 : vector<8x32xf32> to vector<8x32xbf16>
    %c0_18 = arith.constant 0 : index
    %c0_19 = arith.constant 0 : index
    %16 = vector.load %arg4[%c0_18, %c0_19] : memref<32x32xbf16, #tpu.memory_space<vmem>>, vector<32x32xbf16>
    %cst = arith.constant dense<0.000000e+00> : vector<8x32xf32>
    %17 = tpu.matmul %15, %16, %cst {dimension_numbers = #tpu.dot_dimension_numbers<[1], [0], [0], [1], [0, 0, 1, 1], [], []>} : vector<8x32xbf16>, vector<32x32xbf16>, vector<8x32xf32> -> vector<8x32xf32>
    %18 = vector.broadcast %6 : vector<1x32xf32> to vector<8x32xf32>
    %19 = arith.addf %17, %18 : vector<8x32xf32>
    %20 = arith.truncf %3 : vector<8x32xf32> to vector<8x32xbf16>
    %c0_20 = arith.constant 0 : index
    %c0_21 = arith.constant 0 : index
    %21 = vector.load %arg5[%c0_20, %c0_21] : memref<32x32xbf16, #tpu.memory_space<vmem>>, vector<32x32xbf16>
    %cst_22 = arith.constant dense<0.000000e+00> : vector<8x32xf32>
    %22 = tpu.matmul %20, %21, %cst_22 {dimension_numbers = #tpu.dot_dimension_numbers<[1], [0], [0], [1], [0, 0, 1, 1], [], []>} : vector<8x32xbf16>, vector<32x32xbf16>, vector<8x32xf32> -> vector<8x32xf32>
    %23 = vector.broadcast %7 : vector<1x32xf32> to vector<8x32xf32>
    %24 = arith.addf %22, %23 : vector<8x32xf32>
    %25 = arith.truncf %5 : vector<8x32xf32> to vector<8x32xbf16>
    %c0_23 = arith.constant 0 : index
    %c0_24 = arith.constant 0 : index
    %26 = vector.load %arg6[%c0_23, %c0_24] : memref<32x32xbf16, #tpu.memory_space<vmem>>, vector<32x32xbf16>
    %cst_25 = arith.constant dense<0.000000e+00> : vector<8x32xf32>
    %27 = tpu.matmul %25, %26, %cst_25 {dimension_numbers = #tpu.dot_dimension_numbers<[1], [0], [0], [1], [0, 0, 1, 1], [], []>} : vector<8x32xbf16>, vector<32x32xbf16>, vector<8x32xf32> -> vector<8x32xf32>
    %28 = vector.broadcast %8 : vector<1x32xf32> to vector<8x32xf32>
    %29 = arith.addf %27, %28 : vector<8x32xf32>
    %30 = vector.extract_strided_slice %19 {offsets = [0, 0], sizes = [8, 8], strides = [1, 1]} : vector<8x32xf32> to vector<8x8xf32>
    %31 = vector.shape_cast %30 : vector<8x8xf32> to vector<1x8x8xf32>
    %32 = vector.extract_strided_slice %24 {offsets = [0, 0], sizes = [8, 8], strides = [1, 1]} : vector<8x32xf32> to vector<8x8xf32>
    %33 = vector.shape_cast %32 : vector<8x8xf32> to vector<1x8x8xf32>
    %34 = vector.extract_strided_slice %29 {offsets = [0, 0], sizes = [8, 8], strides = [1, 1]} : vector<8x32xf32> to vector<8x8xf32>
    %35 = vector.shape_cast %34 : vector<8x8xf32> to vector<1x8x8xf32>
    "tpu.trace_start"() <{level = 10 : i32, message = "bld,bsd->bls"}> : () -> ()
    %cst_26 = arith.constant dense<0.000000e+00> : vector<1x8x8xf32>
    %36 = tpu.matmul %31, %33, %cst_26 {dimension_numbers = #tpu.dot_dimension_numbers<[2], [2], [1], [1], [0, 0, 0, 1, 1, 1], [0], [0]>} : vector<1x8x8xf32>, vector<1x8x8xf32>, vector<1x8x8xf32> -> vector<1x8x8xf32>
    "tpu.trace_stop"() : () -> ()
    %cst_27 = arith.constant dense<0xFF800000> : vector<1x8xf32>
    %37 = vector.multi_reduction <maximumf>, %36, %cst_27 [2] : vector<1x8x8xf32> to vector<1x8xf32>
    %38 = vector.shape_cast %37 : vector<1x8xf32> to vector<1x8x1xf32>
    %39 = vector.broadcast %38 : vector<1x8x1xf32> to vector<1x8x8xf32>
    %40 = arith.subf %36, %39 : vector<1x8x8xf32>
    %41 = math.exp %40 : vector<1x8x8xf32>
    %cst_28 = arith.constant dense<0.000000e+00> : vector<1x8xf32>
    %42 = vector.multi_reduction <add>, %41, %cst_28 [2] : vector<1x8x8xf32> to vector<1x8xf32>
    %43 = vector.shape_cast %42 : vector<1x8xf32> to vector<1x8x1xf32>
    %44 = tpu.reciprocal %43 {approx = true} : vector<1x8x1xf32> -> vector<1x8x1xf32>
    %45 = vector.broadcast %44 : vector<1x8x1xf32> to vector<1x8x8xf32>
    %46 = arith.mulf %41, %45 : vector<1x8x8xf32>
    "tpu.trace_start"() <{level = 10 : i32, message = "bls,bsd->bld"}> : () -> ()
    %cst_29 = arith.constant dense<0.000000e+00> : vector<1x8x8xf32>
    %47 = tpu.matmul %46, %35, %cst_29 {dimension_numbers = #tpu.dot_dimension_numbers<[2], [1], [1], [2], [0, 0, 0, 1, 1, 2], [0], [0]>} : vector<1x8x8xf32>, vector<1x8x8xf32>, vector<1x8x8xf32> -> vector<1x8x8xf32>
    "tpu.trace_stop"() : () -> ()
    %48 = vector.shape_cast %47 : vector<1x8x8xf32> to vector<8x8xf32>
    %49 = vector.extract_strided_slice %19 {offsets = [0, 8], sizes = [8, 8], strides = [1, 1]} : vector<8x32xf32> to vector<8x8xf32>
    %50 = vector.shape_cast %49 : vector<8x8xf32> to vector<1x8x8xf32>
    %51 = vector.extract_strided_slice %24 {offsets = [0, 8], sizes = [8, 8], strides = [1, 1]} : vector<8x32xf32> to vector<8x8xf32>
    %52 = vector.shape_cast %51 : vector<8x8xf32> to vector<1x8x8xf32>
    %53 = vector.extract_strided_slice %29 {offsets = [0, 8], sizes = [8, 8], strides = [1, 1]} : vector<8x32xf32> to vector<8x8xf32>
    %54 = vector.shape_cast %53 : vector<8x8xf32> to vector<1x8x8xf32>
    "tpu.trace_start"() <{level = 10 : i32, message = "bld,bsd->bls"}> : () -> ()
    %cst_30 = arith.constant dense<0.000000e+00> : vector<1x8x8xf32>
    %55 = tpu.matmul %50, %52, %cst_30 {dimension_numbers = #tpu.dot_dimension_numbers<[2], [2], [1], [1], [0, 0, 0, 1, 1, 1], [0], [0]>} : vector<1x8x8xf32>, vector<1x8x8xf32>, vector<1x8x8xf32> -> vector<1x8x8xf32>
    "tpu.trace_stop"() : () -> ()
    %cst_31 = arith.constant dense<0xFF800000> : vector<1x8xf32>
    %56 = vector.multi_reduction <maximumf>, %55, %cst_31 [2] : vector<1x8x8xf32> to vector<1x8xf32>
    %57 = vector.shape_cast %56 : vector<1x8xf32> to vector<1x8x1xf32>
    %58 = vector.broadcast %57 : vector<1x8x1xf32> to vector<1x8x8xf32>
    %59 = arith.subf %55, %58 : vector<1x8x8xf32>
    %60 = math.exp %59 : vector<1x8x8xf32>
    %cst_32 = arith.constant dense<0.000000e+00> : vector<1x8xf32>
    %61 = vector.multi_reduction <add>, %60, %cst_32 [2] : vector<1x8x8xf32> to vector<1x8xf32>
    %62 = vector.shape_cast %61 : vector<1x8xf32> to vector<1x8x1xf32>
    %63 = tpu.reciprocal %62 {approx = true} : vector<1x8x1xf32> -> vector<1x8x1xf32>
    %64 = vector.broadcast %63 : vector<1x8x1xf32> to vector<1x8x8xf32>
    %65 = arith.mulf %60, %64 : vector<1x8x8xf32>
    "tpu.trace_start"() <{level = 10 : i32, message = "bls,bsd->bld"}> : () -> ()
    %cst_33 = arith.constant dense<0.000000e+00> : vector<1x8x8xf32>
    %66 = tpu.matmul %65, %54, %cst_33 {dimension_numbers = #tpu.dot_dimension_numbers<[2], [1], [1], [2], [0, 0, 0, 1, 1, 2], [0], [0]>} : vector<1x8x8xf32>, vector<1x8x8xf32>, vector<1x8x8xf32> -> vector<1x8x8xf32>
    "tpu.trace_stop"() : () -> ()
    %67 = vector.shape_cast %66 : vector<1x8x8xf32> to vector<8x8xf32>
    %68 = vector.extract_strided_slice %19 {offsets = [0, 16], sizes = [8, 8], strides = [1, 1]} : vector<8x32xf32> to vector<8x8xf32>
    %69 = vector.shape_cast %68 : vector<8x8xf32> to vector<1x8x8xf32>
    %70 = vector.extract_strided_slice %24 {offsets = [0, 16], sizes = [8, 8], strides = [1, 1]} : vector<8x32xf32> to vector<8x8xf32>
    %71 = vector.shape_cast %70 : vector<8x8xf32> to vector<1x8x8xf32>
    %72 = vector.extract_strided_slice %29 {offsets = [0, 16], sizes = [8, 8], strides = [1, 1]} : vector<8x32xf32> to vector<8x8xf32>
    %73 = vector.shape_cast %72 : vector<8x8xf32> to vector<1x8x8xf32>
    "tpu.trace_start"() <{level = 10 : i32, message = "bld,bsd->bls"}> : () -> ()
    %cst_34 = arith.constant dense<0.000000e+00> : vector<1x8x8xf32>
    %74 = tpu.matmul %69, %71, %cst_34 {dimension_numbers = #tpu.dot_dimension_numbers<[2], [2], [1], [1], [0, 0, 0, 1, 1, 1], [0], [0]>} : vector<1x8x8xf32>, vector<1x8x8xf32>, vector<1x8x8xf32> -> vector<1x8x8xf32>
    "tpu.trace_stop"() : () -> ()
    %cst_35 = arith.constant dense<0xFF800000> : vector<1x8xf32>
    %75 = vector.multi_reduction <maximumf>, %74, %cst_35 [2] : vector<1x8x8xf32> to vector<1x8xf32>
    %76 = vector.shape_cast %75 : vector<1x8xf32> to vector<1x8x1xf32>
    %77 = vector.broadcast %76 : vector<1x8x1xf32> to vector<1x8x8xf32>
    %78 = arith.subf %74, %77 : vector<1x8x8xf32>
    %79 = math.exp %78 : vector<1x8x8xf32>
    %cst_36 = arith.constant dense<0.000000e+00> : vector<1x8xf32>
    %80 = vector.multi_reduction <add>, %79, %cst_36 [2] : vector<1x8x8xf32> to vector<1x8xf32>
    %81 = vector.shape_cast %80 : vector<1x8xf32> to vector<1x8x1xf32>
    %82 = tpu.reciprocal %81 {approx = true} : vector<1x8x1xf32> -> vector<1x8x1xf32>
    %83 = vector.broadcast %82 : vector<1x8x1xf32> to vector<1x8x8xf32>
    %84 = arith.mulf %79, %83 : vector<1x8x8xf32>
    "tpu.trace_start"() <{level = 10 : i32, message = "bls,bsd->bld"}> : () -> ()
    %cst_37 = arith.constant dense<0.000000e+00> : vector<1x8x8xf32>
    %85 = tpu.matmul %84, %73, %cst_37 {dimension_numbers = #tpu.dot_dimension_numbers<[2], [1], [1], [2], [0, 0, 0, 1, 1, 2], [0], [0]>} : vector<1x8x8xf32>, vector<1x8x8xf32>, vector<1x8x8xf32> -> vector<1x8x8xf32>
    "tpu.trace_stop"() : () -> ()
    %86 = vector.shape_cast %85 : vector<1x8x8xf32> to vector<8x8xf32>
    %87 = vector.extract_strided_slice %19 {offsets = [0, 24], sizes = [8, 8], strides = [1, 1]} : vector<8x32xf32> to vector<8x8xf32>
    %88 = vector.shape_cast %87 : vector<8x8xf32> to vector<1x8x8xf32>
    %89 = vector.extract_strided_slice %24 {offsets = [0, 24], sizes = [8, 8], strides = [1, 1]} : vector<8x32xf32> to vector<8x8xf32>
    %90 = vector.shape_cast %89 : vector<8x8xf32> to vector<1x8x8xf32>
    %91 = vector.extract_strided_slice %29 {offsets = [0, 24], sizes = [8, 8], strides = [1, 1]} : vector<8x32xf32> to vector<8x8xf32>
    %92 = vector.shape_cast %91 : vector<8x8xf32> to vector<1x8x8xf32>
    "tpu.trace_start"() <{level = 10 : i32, message = "bld,bsd->bls"}> : () -> ()
    %cst_38 = arith.constant dense<0.000000e+00> : vector<1x8x8xf32>
    %93 = tpu.matmul %88, %90, %cst_38 {dimension_numbers = #tpu.dot_dimension_numbers<[2], [2], [1], [1], [0, 0, 0, 1, 1, 1], [0], [0]>} : vector<1x8x8xf32>, vector<1x8x8xf32>, vector<1x8x8xf32> -> vector<1x8x8xf32>
    "tpu.trace_stop"() : () -> ()
    %cst_39 = arith.constant dense<0xFF800000> : vector<1x8xf32>
    %94 = vector.multi_reduction <maximumf>, %93, %cst_39 [2] : vector<1x8x8xf32> to vector<1x8xf32>
    %95 = vector.shape_cast %94 : vector<1x8xf32> to vector<1x8x1xf32>
    %96 = vector.broadcast %95 : vector<1x8x1xf32> to vector<1x8x8xf32>
    %97 = arith.subf %93, %96 : vector<1x8x8xf32>
    %98 = math.exp %97 : vector<1x8x8xf32>
    %cst_40 = arith.constant dense<0.000000e+00> : vector<1x8xf32>
    %99 = vector.multi_reduction <add>, %98, %cst_40 [2] : vector<1x8x8xf32> to vector<1x8xf32>
    %100 = vector.shape_cast %99 : vector<1x8xf32> to vector<1x8x1xf32>
    %101 = tpu.reciprocal %100 {approx = true} : vector<1x8x1xf32> -> vector<1x8x1xf32>
    %102 = vector.broadcast %101 : vector<1x8x1xf32> to vector<1x8x8xf32>
    %103 = arith.mulf %98, %102 : vector<1x8x8xf32>
    "tpu.trace_start"() <{level = 10 : i32, message = "bls,bsd->bld"}> : () -> ()
    %cst_41 = arith.constant dense<0.000000e+00> : vector<1x8x8xf32>
    %104 = tpu.matmul %103, %92, %cst_41 {dimension_numbers = #tpu.dot_dimension_numbers<[2], [1], [1], [2], [0, 0, 0, 1, 1, 2], [0], [0]>} : vector<1x8x8xf32>, vector<1x8x8xf32>, vector<1x8x8xf32> -> vector<1x8x8xf32>
    "tpu.trace_stop"() : () -> ()
    %105 = vector.shape_cast %104 : vector<1x8x8xf32> to vector<8x8xf32>
    %106 = tpu.concatenate %48, %67, %86, %105 in 1 : vector<8x8xf32>, vector<8x8xf32>, vector<8x8xf32>, vector<8x8xf32> -> vector<8x32xf32>
    %107 = arith.truncf %106 : vector<8x32xf32> to vector<8x32xbf16>
    %c0_42 = arith.constant 0 : index
    %c0_43 = arith.constant 0 : index
    %108 = vector.load %arg7[%c0_42, %c0_43] : memref<32x32xbf16, #tpu.memory_space<vmem>>, vector<32x32xbf16>
    %cst_44 = arith.constant dense<0.000000e+00> : vector<8x32xf32>
    %109 = tpu.matmul %107, %108, %cst_44 {dimension_numbers = #tpu.dot_dimension_numbers<[1], [0], [0], [1], [0, 0, 1, 1], [], []>} : vector<8x32xbf16>, vector<32x32xbf16>, vector<8x32xf32> -> vector<8x32xf32>
    %110 = vector.broadcast %9 : vector<1x32xf32> to vector<8x32xf32>
    %111 = arith.addf %109, %110 : vector<8x32xf32>
    %112 = arith.addf %5, %111 : vector<8x32xf32>
    %cst_45 = arith.constant dense<0.000000e+00> : vector<8xf32>
    %113 = vector.multi_reduction <add>, %112, %cst_45 [1] : vector<8x32xf32> to vector<8xf32>
    %114 = vector.shape_cast %113 : vector<8xf32> to vector<8x1xf32>
    %cst_46 = arith.constant 3.200000e+01 : f32
    %115 = vector.broadcast %cst_46 : f32 to vector<8x1xf32>
    %116 = arith.divf %114, %115 : vector<8x1xf32>
    %117 = vector.broadcast %116 : vector<8x1xf32> to vector<8x32xf32>
    %118 = arith.subf %112, %117 : vector<8x32xf32>
    %119 = arith.mulf %118, %118 : vector<8x32xf32>
    %cst_47 = arith.constant dense<0.000000e+00> : vector<8xf32>
    %120 = vector.multi_reduction <add>, %119, %cst_47 [1] : vector<8x32xf32> to vector<8xf32>
    %121 = vector.shape_cast %120 : vector<8xf32> to vector<8x1xf32>
    %cst_48 = arith.constant 3.200000e+01 : f32
    %122 = vector.broadcast %cst_48 : f32 to vector<8x1xf32>
    %123 = arith.divf %121, %122 : vector<8x1xf32>
    %124 = vector.broadcast %116 : vector<8x1xf32> to vector<8x32xf32>
    %125 = arith.subf %112, %124 : vector<8x32xf32>
    %cst_49 = arith.constant 9.99999974E-6 : f32
    %126 = vector.broadcast %cst_49 : f32 to vector<8x1xf32>
    %127 = arith.addf %123, %126 : vector<8x1xf32>
    %128 = math.rsqrt %127 : vector<8x1xf32>
    %129 = vector.broadcast %128 : vector<8x1xf32> to vector<8x32xf32>
    %130 = arith.mulf %125, %129 : vector<8x32xf32>
    %131 = vector.broadcast %11 : vector<1x32xf32> to vector<8x32xf32>
    %132 = arith.mulf %130, %131 : vector<8x32xf32>
    %133 = vector.broadcast %12 : vector<1x32xf32> to vector<8x32xf32>
    %134 = arith.addf %132, %133 : vector<8x32xf32>
    %135 = arith.truncf %134 : vector<8x32xf32> to vector<8x32xbf16>
    %c0_50 = arith.constant 0 : index
    %c0_51 = arith.constant 0 : index
    %136 = vector.load %arg9[%c0_50, %c0_51] : memref<32x64xbf16, #tpu.memory_space<vmem>>, vector<32x64xbf16>
    %cst_52 = arith.constant dense<0.000000e+00> : vector<8x64xf32>
    %137 = tpu.matmul %135, %136, %cst_52 {dimension_numbers = #tpu.dot_dimension_numbers<[1], [0], [0], [1], [0, 0, 1, 1], [], []>} : vector<8x32xbf16>, vector<32x64xbf16>, vector<8x64xf32> -> vector<8x64xf32>
    %c0_53 = arith.constant 0 : index
    %c0_54 = arith.constant 0 : index
    %138 = vector.load %arg10[%c0_53, %c0_54] : memref<1x64xf32, #tpu.memory_space<vmem>>, vector<1x64xf32>
    %139 = vector.broadcast %138 : vector<1x64xf32> to vector<8x64xf32>
    %140 = arith.addf %137, %139 : vector<8x64xf32>
    %cst_55 = arith.constant 0.000000e+00 : f32
    %141 = vector.broadcast %cst_55 : f32 to vector<8x64xf32>
    %142 = arith.maximumf %140, %141 : vector<8x64xf32>
    %143 = arith.truncf %142 : vector<8x64xf32> to vector<8x64xbf16>
    %c0_56 = arith.constant 0 : index
    %c0_57 = arith.constant 0 : index
    %144 = vector.load %arg11[%c0_56, %c0_57] : memref<64x32xbf16, #tpu.memory_space<vmem>>, vector<64x32xbf16>
    %cst_58 = arith.constant dense<0.000000e+00> : vector<8x32xf32>
    %145 = tpu.matmul %143, %144, %cst_58 {dimension_numbers = #tpu.dot_dimension_numbers<[1], [0], [0], [1], [0, 0, 1, 1], [], []>} : vector<8x64xbf16>, vector<64x32xbf16>, vector<8x32xf32> -> vector<8x32xf32>
    %146 = vector.broadcast %10 : vector<1x32xf32> to vector<8x32xf32>
    %147 = arith.addf %145, %146 : vector<8x32xf32>
    %148 = arith.addf %134, %147 : vector<8x32xf32>
    %cst_59 = arith.constant dense<0.000000e+00> : vector<8xf32>
    %149 = vector.multi_reduction <add>, %148, %cst_59 [1] : vector<8x32xf32> to vector<8xf32>
    %150 = vector.shape_cast %149 : vector<8xf32> to vector<8x1xf32>
    %cst_60 = arith.constant 3.200000e+01 : f32
    %151 = vector.broadcast %cst_60 : f32 to vector<8x1xf32>
    %152 = arith.divf %150, %151 : vector<8x1xf32>
    %153 = vector.broadcast %152 : vector<8x1xf32> to vector<8x32xf32>
    %154 = arith.subf %148, %153 : vector<8x32xf32>
    %155 = arith.mulf %154, %154 : vector<8x32xf32>
    %cst_61 = arith.constant dense<0.000000e+00> : vector<8xf32>
    %156 = vector.multi_reduction <add>, %155, %cst_61 [1] : vector<8x32xf32> to vector<8xf32>
    %157 = vector.shape_cast %156 : vector<8xf32> to vector<8x1xf32>
    %cst_62 = arith.constant 3.200000e+01 : f32
    %158 = vector.broadcast %cst_62 : f32 to vector<8x1xf32>
    %159 = arith.divf %157, %158 : vector<8x1xf32>
    %160 = vector.broadcast %152 : vector<8x1xf32> to vector<8x32xf32>
    %161 = arith.subf %148, %160 : vector<8x32xf32>
    %cst_63 = arith.constant 9.99999974E-6 : f32
    %162 = vector.broadcast %cst_63 : f32 to vector<8x1xf32>
    %163 = arith.addf %159, %162 : vector<8x1xf32>
    %164 = math.rsqrt %163 : vector<8x1xf32>
    %165 = vector.broadcast %164 : vector<8x1xf32> to vector<8x32xf32>
    %166 = arith.mulf %161, %165 : vector<8x32xf32>
    %167 = vector.broadcast %13 : vector<1x32xf32> to vector<8x32xf32>
    %168 = arith.mulf %166, %167 : vector<8x32xf32>
    %169 = vector.broadcast %14 : vector<1x32xf32> to vector<8x32xf32>
    %170 = arith.addf %168, %169 : vector<8x32xf32>
    %171 = vector.shape_cast %170 : vector<8x32xf32> to vector<1x8x32xf32>
    %c0_64 = arith.constant 0 : index
    %c0_65 = arith.constant 0 : index
    %c0_66 = arith.constant 0 : index
    %172 = vector.load %arg12[%c0_64, %c0_65, %c0_66] : memref<1x8x32xf32, #tpu.memory_space<vmem>>, vector<1x8x32xf32>
    tpu.vector_store %arg12[%c0_64, %c0_65, %c0_66], %171 {strides = array<i32>} : memref<1x8x32xf32, #tpu.memory_space<vmem>>, vector<1x8x32xf32>,
    return
  }
  func.func @transform_0(%arg0: i32) -> (i32, i32, i32) {
    %c0_i32 = arith.constant 0 : i32
    %c0_i32_0 = arith.constant 0 : i32
    %c0_i32_1 = arith.constant 0 : i32
    return %arg0, %c0_i32, %c0_i32_0 : i32, i32, i32
  }
  func.func @transform_1(%arg0: i32) -> (i32, i32, i32) {
    %c0_i32 = arith.constant 0 : i32
    %c0_i32_0 = arith.constant 0 : i32
    %c0_i32_1 = arith.constant 0 : i32
    return %arg0, %c0_i32, %c0_i32_0 : i32, i32, i32
  }
  func.func @transform_2(%arg0: i32) -> (i32, i32, i32) {
    %c0_i32 = arith.constant 0 : i32
    %c0_i32_0 = arith.constant 0 : i32
    %c0_i32_1 = arith.constant 0 : i32
    return %arg0, %c0_i32, %c0_i32_0 : i32, i32, i32
  }
  func.func @transform_3(%arg0: i32) -> (i32, i32) {
    %c0_i32 = arith.constant 0 : i32
    %c0_i32_0 = arith.constant 0 : i32
    %c0_i32_1 = arith.constant 0 : i32
    return %c0_i32, %c0_i32_0 : i32, i32
  }
  func.func @transform_4(%arg0: i32) -> (i32, i32) {
    %c0_i32 = arith.constant 0 : i32
    %c0_i32_0 = arith.constant 0 : i32
    %c0_i32_1 = arith.constant 0 : i32
    return %c0_i32, %c0_i32_0 : i32, i32
  }
  func.func @transform_5(%arg0: i32) -> (i32, i32) {
    %c0_i32 = arith.constant 0 : i32
    %c0_i32_0 = arith.constant 0 : i32
    %c0_i32_1 = arith.constant 0 : i32
    return %c0_i32, %c0_i32_0 : i32, i32
  }
  func.func @transform_6(%arg0: i32) -> (i32, i32) {
    %c0_i32 = arith.constant 0 : i32
    %c0_i32_0 = arith.constant 0 : i32
    %c0_i32_1 = arith.constant 0 : i32
    return %c0_i32, %c0_i32_0 : i32, i32
  }
  func.func @transform_7(%arg0: i32) -> (i32, i32) {
    %c0_i32 = arith.constant 0 : i32
    %c0_i32_0 = arith.constant 0 : i32
    %c0_i32_1 = arith.constant 0 : i32
    return %c0_i32, %c0_i32_0 : i32, i32
  }
  func.func @transform_8(%arg0: i32) -> (i32, i32) {
    %c0_i32 = arith.constant 0 : i32
    %c0_i32_0 = arith.constant 0 : i32
    %c0_i32_1 = arith.constant 0 : i32
    return %c0_i32, %c0_i32_0 : i32, i32
  }
  func.func @transform_9(%arg0: i32) -> (i32, i32) {
    %c0_i32 = arith.constant 0 : i32
    %c0_i32_0 = arith.constant 0 : i32
    %c0_i32_1 = arith.constant 0 : i32
    return %c0_i32, %c0_i32_0 : i32, i32
  }
  func.func @transform_10(%arg0: i32) -> (i32, i32) {
    %c0_i32 = arith.constant 0 : i32
    %c0_i32_0 = arith.constant 0 : i32
    %c0_i32_1 = arith.constant 0 : i32
    return %c0_i32, %c0_i32_0 : i32, i32
  }
  func.func @transform_11(%arg0: i32) -> (i32, i32, i32) {
    %c0_i32 = arith.constant 0 : i32
    %c0_i32_0 = arith.constant 0 : i32
    %c0_i32_1 = arith.constant 0 : i32
    return %arg0, %c0_i32, %c0_i32_0 : i32, i32, i32
  }
}

</mosaic_0001>

<bundles_post_ra>
// kernel: tpu_custom_call.1
= control target key start
LH: loop header
LB: loop body
LE: loop exit
PB: predicated region body
PF: predicated region fallthrough
CT: control target
= control target key end

     0   :  { %s2078_s0 = inlined_call_operand.vmem [shape: f32[2,8,32], index: 0, kind: input, shape index: {}]   ;;  %s2079_s1 = inlined_call_operand.vmem [shape: f32[2,8,32], index: 1, kind: input, shape index: {}]   ;;  %s2080_s2 = inlined_call_operand.vmem [shape: f32[2,8,32], index: 2, kind: input, shape index: {}]   ;;  %s2081_s3 = inlined_call_operand.hbm [shape: bf16[32,32], index: 3, kind: input, shape index: {}]   ;;  %s2082_s4 = inlined_call_operand.hbm [shape: bf16[32,32], index: 4, kind: input, shape index: {}]   ;;  %s2083_s5 = inlined_call_operand.hbm [shape: bf16[32,32], index: 5, kind: input, shape index: {}]   ;;  %s2084_s6 = inlined_call_operand.hbm [shape: bf16[32,32], index: 6, kind: input, shape index: {}]   ;;  %s2085_s7 = inlined_call_operand.hbm [shape: f32[9,32], index: 7, kind: input, shape index: {}]   ;;  %s2086_s8 = inlined_call_operand.hbm [shape: bf16[32,64], index: 8, kind: input, shape index: {}]   ;;  %s2087_s9 = inlined_call_operand.vmem [shape: f32[1,64], index: 9, kind: input, shape index: {}]   ;;  %s2088_s10 = inlined_call_operand.vmem [shape: bf16[64,32], index: 10, kind: input, shape index: {}]   ;;  %s2089_s11 = inlined_call_operand.hbm [shape: f32[2,8,32], index: 11, kind: output, shape index: {}]  }
   0x1   :  { %2094 = sst [smem:[#allocation23_spill]] %s2082_s4 }
   0x2   :  { %2095 = sst [smem:[#allocation24_spill]] %s2084_s6 }
   0x3   :  { %16 = vsyncpa [#allocation3], 0 }
   0x4   :  { %17 = vsyncpa [#allocation6], 0 }
   0x5   :  { %18 = vsyncpa [#allocation9], 0 }
   0x6   :  { %19 = vsyncpa [#allocation12], 0 }
   0x7   :  { %20 = vsyncpa [#allocation4], 0 }
   0x8   :  { %22 = vsyncpa [#allocation4 + $0x1], 0  ;;  %s1842_s17 = smov 0   ;;  %s1844_s18 = smov 0  }
   0x9   :  { %s1846_s19 = smov 0   ;;  %s1848_s20 = smov 0  }
   0xa LB: > { %2096 = sst [smem:[#allocation19_spill]] %s1759_s19  ;;  %s1863_s21 = sadd.s32 4294967295, %s1763_s20   ;;  %s1763_s20 = sphi %s1848_s20, %s2107_s20   ;;  %s1759_s19 = sphi %s1846_s19, %s2109_s19   ;;  %s1755_s18 = sphi %s1844_s18, %s2111_s18   ;;  %s1751_s17 = sphi %s1842_s17, %s2110_s17  }
   0xb   : > { %s1250_s22 = sadd.s32 4294967294, %s1763_s20   ;;  %s1867_s23 = sadd.s32 1, %s1763_s20  }
   0xc   : > { %2097 = sst [smem:[#allocation20_spill]] %s1867_s23  ;;  %s281_s24 = sadd.s32 1, %s1759_s19 }
   0xd   : > { %s278_s25 = ssub.s32 %s1763_s20, %s1867_s23  ;;  %p291_p0 = scmp.ne.s32.totalorder %s1759_s19, %s1755_s18 }
   0xe   : > { %p279_p1 = scmp.eq.s32.totalorder %s278_s25, 0  ;;  %p292_p2 = scmp.eq.s32.totalorder %s1863_s21, 1 }
   0xf   : > { %p297_p3 = scmp.ne.s32.totalorder %s1755_s18, %s1751_s17  ;;  %p298_p4 = scmp.eq.s32.totalorder %s1250_s22, 1 }
  0x10   : > { %s1878_s26 = scalar_select %p279_p1, %s1759_s19, %s281_s24  }
  0x11   : > { %p1880_p5 = por %p292_p2, %p291_p0  ;;  %p1884_p6 = por %p298_p4, %p297_p3 }
  0x12   : > { %2098 = sst [smem:[#allocation21_spill]] %s1878_s26  ;;  %p1251_p7 = scmp.ge.s32.totalorder %s1763_s20, 1 }
  0x13   : > { %s2100_s28 = scalar_select %p1884_p6, 1, 0 }
  0x14   : > { %p305_p8 = scmp.lt.s32.totalorder %s1763_s20, 3  ;;  %p1411_p9 = scmp.eq.s32.totalorder %s1863_s21, 0 }
  0x15   : > { %2101 = sst [smem:[#allocation22_spill]] %s2100_s28  ;;  %s1765_s24 = smov [#allocation5]  }
  0x16   : > { %p1891_p10 = pnand %p1251_p7, %p305_p8  ;;  %s2103_s4 = sld [smem:[#allocation23_spill]] }
  0x17   : > { %s2104_s6 = sld [smem:[#allocation24_spill]]  ;;  %s332_s25 = sshll.u32 %s1765_s24, 4  ;;  %s333_s25 = int_to_ptr.vmem [resolvable:$true] %s332_s25 }
  0x18   : > { %p1388_p11 = pneg %p1891_p10  ;;  %s1766_s30 = smov 64  }
  0x19   : > { %s1767_s12 = smov 4   ;;  %s1768_s14 = smov [#allocation8]  }
  0x1a   : > { %p1905_p12 = pnand %p1411_p9, %p1388_p11  ;;  %s360_s15 = sshll.u32 %s1768_s14, 4  ;;  %s361_s15 = int_to_ptr.vmem [resolvable:$true] %s360_s15 }
  0x1b   : > { %s316_s26 = sshll.u32 %s2081_s3, 4  ;;  %s344_s23 = sshll.u32 %s2083_s5, 4  ;;  %s317_s26 = int_to_ptr.hbm [resolvable:$true] %s316_s26  ;;  %s345_s23 = int_to_ptr.hbm [resolvable:$true] %s344_s23 }
  0x1c   : > { %s330_s13 = sshll.u32 %s2103_s4, 4  ;;  %s1769_s28 = smov [#allocation2]   ;;  %s331_s13 = int_to_ptr.hbm [resolvable:$true] %s330_s13 }
  0x1d   : > { %s358_s16 = sshll.u32 %s2104_s6, 4  ;;  %s1770_s4 = smov [#allocation7]   ;;  %s359_s16 = int_to_ptr.hbm [resolvable:$true] %s358_s16 }
  0x1e   : > { %1394 = dma.hbm_to_vmem [thread:$0]  (!%p1905_p12), %s331_s13, 256, %s333_s25, [#allocation6], %s1766_s30, %s1766_s30, %s1767_s12  }
  0x1f   : > { %1400 = dma.hbm_to_vmem [thread:$0]  (!%p1905_p12), %s359_s16, 256, %s361_s15, [#allocation9], %s1766_s30, %s1766_s30, %s1767_s12  }
  0x20   : > { %s318_s13 = sshll.u32 %s1769_s28, 4  ;;  %s346_s6 = sshll.u32 %s1770_s4, 4  ;;  %s319_s13 = int_to_ptr.vmem [resolvable:$true] %s318_s13  ;;  %s347_s6 = int_to_ptr.vmem [resolvable:$true] %s346_s6 }
  0x21   : > { %1391 = dma.hbm_to_vmem [thread:$0]  (!%p1905_p12), %s317_s26, 256, %s319_s13, [#allocation3], %s1766_s30, %s1766_s30, %s1767_s12  }
  0x22   : > { %s372_s16 = sshll.u32 %s2085_s7, 4  ;;  %s1771_s19 = smov [#allocation10]   ;;  %s373_s16 = int_to_ptr.hbm [resolvable:$true] %s372_s16 }
  0x23   : > { %1397 = dma.hbm_to_vmem [thread:$0]  (!%p1905_p12), %s345_s23, 256, %s347_s6, [#allocation6], %s1766_s30, %s1766_s30, %s1767_s12  }
  0x24   : > { %s374_s28 = sshll.u32 %s1771_s19, 4  ;;  %s386_s26 = sshll.u32 %s2086_s8, 4  ;;  %s375_s28 = int_to_ptr.vmem [resolvable:$true] %s374_s28  ;;  %s387_s26 = int_to_ptr.hbm [resolvable:$true] %s386_s26 }
  0x25   : > { %s1772_s13 = smov 128   ;;  %s1773_s4 = smov 8  }
  0x26   : > { %1403 = dma.hbm_to_vmem [thread:$0]  (!%p1905_p12), %s373_s16, 256, %s375_s28, [#allocation9], %s1772_s13, %s1772_s13, %s1773_s4  }
  0x27   : > { %s1774_s25 = smov [#allocation11]   ;;  %431 = sbr.rel (%p1891_p10) target bundleno = 2187 (0x88b), region = 64 }
  0x28   : > { %s388_s14 = sshll.u32 %s1774_s25, 4  ;;  %s389_s14 = int_to_ptr.vmem [resolvable:$true] %s388_s14 }
  0x29   : > { %1406 = dma.hbm_to_vmem [thread:$0]  (!%p1905_p12), %s387_s26, 256, %s389_s14, [#allocation12], %s1766_s30, %s1766_s30, %s1767_s12  }
  0x2c   : > { %1730 = dma.done.wait (%p1411_p9), [#allocation3], 256  }
  0x2d   : > { %1732 = vsyncadd (%p1411_p9), [#allocation3], 4294967040 }
  0x2e   : > { %1734 = dma.done.wait (%p1411_p9), [#allocation6], 512  }
  0x2f   : > { %1736 = vsyncadd (%p1411_p9), [#allocation6], 4294966784 }
  0x30   : > { %1738 = dma.done.wait (%p1411_p9), [#allocation9], 512  }
  0x31   : > { %1740 = vsyncadd (%p1411_p9), [#allocation9], 4294966784 }
  0x32   : > { %1742 = dma.done.wait (%p1411_p9), [#allocation12], 256  }
  0x33   : > { %1744 = vsyncadd (%p1411_p9), [#allocation12], 4294967040  ;;  %p504_p13 = scmp.lt.s32.totalorder %s1863_s21, 1  ;;  %v1349_v0 = vld [vmem:[#allocation2 + $0x8] sm:$0xff]  ;;  %v1351_v1 = vld [vmem:[#allocation5 + $0x8] sm:$0xff]  ;;  %vm547_vm0 = vcmask 261120  }
  0x34   : > { %v1348_v2 = vld [vmem:[#allocation2] sm:$0xff]  ;;  %v1350_v3 = vld [vmem:[#allocation5] sm:$0xff]  ;;  %557 = vmatpush.bf16.msra.mxu0 %v1349_v0  ;;  %591 = vmatpush.bf16.msra.mxu1 %v1351_v1  ;;  %v1353_v6 = vld [vmem:[#allocation7 + $0x8] sm:$0xff]  ;;  %vm632_vm1 = vcmask 64512   ;;  %s1775_s26 = smov 112   ;;  %s1776_s13 = smov 120  }
  0x35   : > { %s505_s23 = scalar_select %p504_p13, %s1863_s21, 1  ;;  %v1352_v7 = vld [vmem:[#allocation7] sm:$0xff]  ;;  %625 = vmatpush.bf16.msra.mxu2 %v1353_v6  ;;  %vm902_vm2 = vcmask 130048   ;;  %vm904_vm3 = vcmask 195584   ;;  %vm1046_vm8 = vcmask 523264  }
  0x36   : > { %v1474_v12 = vld [vmem:[#allocation10 + $0x1] ss:$0 sm:$0xff]  ;;  %v1473_v13 = vld [vmem:[#allocation10] ss:$0 sm:$0xff]  ;;  %s1777_s4 = smov 104   ;;  %s1778_s25 = smov 8  }
  0x37   : > { %s1267_s29 = sshll.u32 %s505_s23, 3  ;;  %v1475_v20 = vld [vmem:[#allocation10 + $0x2] ss:$0 sm:$0xff]  ;;  %s1779_s14 = smov 24  }
  0x38   : > { %s507_s12 = scalar_lea.vmem %s2078_s0, %s1267_s29  ;;  %s511_s19 = scalar_lea.vmem %s2079_s1, %s1267_s29  ;;  %558 = vmatpush.bf16.msra.mxu0 %v1348_v2  ;;  %592 = vmatpush.bf16.msra.mxu1 %v1350_v3 }
  0x39   : > { %s515_s24 = scalar_lea.vmem %s2080_s2, %s1267_s29  ;;  %v517_v4 = vld [vmem:[%s507_s12] sm:$0xff]  ;;  %626 = vmatpush.bf16.msra.mxu2 %v1352_v7  ;;  %s1780_s23 = smov 16  }
  0x3a   : > { %v518_v5 = vld [vmem:[%s511_s19] sm:$0xff]  ;;  %v529_v9 = vpack.c.bf16 %v517_v4, %v517_v4  ;;  %s1705_s28 = scalar_lea.hbm %s2089_s11, 16 }
  0x3b   : > { %v1977_v8 = vld [vmem:[%s515_s24] sm:$0xff]  ;;  %v564_v10 = vpack.c.bf16 %v518_v5, %v518_v5 }
  0x3c   : > { %v598_v11 = vpack.c.bf16 %v1977_v8, %v1977_v8  ;;  %1278 = vmatmul.msk.bf16.vlgmr.msra.gmra.mxu0 %vm547_vm0, %v529_v9 }
  0x3d   : > { %1287 = vmatmul.msk.bf16.vlgmr.msra.gmra.mxu1 %vm547_vm0, %v564_v10 }
  0x3e   : > { %1296 = vmatmul.msk.bf16.vlgmr.msra.gmra.mxu2 %vm547_vm0, %v598_v11 }
  0xb9   : > { %v560_v14 = vpop.f32.mrf.mxu0 }
  0xba   : > { %v594_v15 = vpop.f32.mrf.mxu1  ;;  %v561_v17 = vadd.f32 %v1473_v13, %v560_v14  ;;  %v1355_v14 = vld [vmem:[#allocation8 + $0x8] sm:$0xff] }
  0xbb   : > { %v595_v16 = vadd.f32 %v1474_v12, %v594_v15  ;;  %v1354_v15 = vld [vmem:[#allocation8] sm:$0xff] }
  0xbd   : > { %761 = vrot.lane.b32.xlu2 %v595_v16, %s1775_s26  ;;  %695 = vrot.lane.b32.xlu1 %v595_v16, %s1776_s13 }
  0xbe   : > { %1297 = vmatpush.xpose.msk.msrb.mxu0 %vm632_vm1, %v595_v16 }
  0xc1   : > { %1298 = vmatmul.msk.f32.vlgmr.msrb.gmra.mxu0 %vm632_vm1, %v561_v17  ;;  %v562_v18 = vpop.f32.mrf.mxu0  ;;  %v628_v21 = vpop.f32.mrf.mxu2 }
  0xc2   : > { %v596_v19 = vpop.f32.mrf.mxu1  ;;  %v1991_v22 = vadd.f32 %v1475_v20, %v628_v21 }
  0xc4   : > { %688 = vmatpush.msra.mxu3 %v1991_v22 }
  0xc5   : > { %826 = vrot.lane.b32.xlu2 %v595_v16, %s1777_s4  ;;  %693 = vrot.lane.b32.xlu1 %v561_v17, %s1776_s13 }
  0xc9   : > { %v630_v23 = vpop.f32.mrf.mxu2 }
  0xca   : > { %v1476_v23 = vld [vmem:[#allocation10 + $0x3] ss:$0 sm:$0xff] }
  0xcd   : > { %824 = vrot.lane.b32.xlu1 %v561_v17, %s1777_s4 }
 0x117   : > { %v762_v24 = vpop.permute.xlu2 %761 }
 0x118   : > { %1303 = vmatpush.xpose.msk.msrb.mxu1 %vm632_vm1, %v762_v24 }
 0x11c   : > { %933 = vmatpush.bf16.msra.mxu1 %v1355_v14 }
 0x11f   : > { %v827_v36 = vpop.permute.xlu2 %826 }
 0x120   : > { %934 = vmatpush.bf16.msra.mxu1 %v1354_v15 }
 0x12f   : > { %v696_v25 = vpop.permute.xlu1 %695 }
 0x130   : > { %1300 = vmatpush.xpose.msk.msrb.mxu3 %vm632_vm1, %v696_v25 }
 0x137   : > { %v694_v37 = vpop.permute.xlu1 %693 }
 0x13e   : > { %v656_v26 = vpop.f32.mrf.mxu0 }
 0x13f   : > { %v659_v27 = vsel %vm632_vm1, %v656_v26, -inf  ;;  %v825_v39 = vpop.permute.xlu1 %824 }
 0x140   : > { %660 = vmax.xlane.f32.xlu0 %v659_v27 }
 0x1b3   : > { %v661_v28 = vpop.xlane.xlu0 %660 }
 0x1b4   : > { %v662_v29 = vsub.f32 %v656_v26, %v661_v28 }
 0x1b6   : > { %v663_v30 = vmul.f32 1.442695, %v662_v29  ;;  %v1781_v29 = vmov 32.0  }
 0x1b8   : > { %1483 = vpow2.f32 %v663_v30 }
 0x1be   : > { %v1484_v31 = vpop.eup %1483 }
 0x1bf   : > { %v665_v32 = vsel %vm632_vm1, %v1484_v31, 0.0 }
 0x1c0   : > { %666 = vadd.xlane.f32.xlu0 %v665_v32 }
 0x1d4   : > { %759 = vrot.lane.b32.xlu0 %v561_v17, %s1775_s26 }
 0x233   : > { %v667_v33 = vpop.xlane.xlu0 %666 }
 0x234   : > { %1485 = vrcp.f32 %v667_v33 }
 0x23a   : > { %v1486_v34 = vpop.eup %1485 }
 0x23b   : > { %v669_v35 = vmul.f32 %v1486_v34, %v1484_v31 }
 0x23d   : > { %1299 = vmatmul.msk.f32.vlgmr.msra.gmra.mxu3 %vm632_vm1, %v669_v35 }
 0x23e   : > { %1306 = vmatpush.xpose.msk.msra.mxu3 %vm632_vm1, %v827_v36 }
 0x245   : > { %1301 = vmatmul.msk.f32.vlgmr.msrb.gmra.mxu3 %vm632_vm1, %v694_v37 }
 0x246   : > { %v760_v38 = vpop.permute.xlu0 %759 }
 0x247   : > { %1304 = vmatmul.msk.f32.vlgmr.msrb.gmra.mxu1 %vm632_vm1, %v760_v38 }
 0x24d   : > { %1307 = vmatmul.msk.f32.vlgmr.msra.gmra.mxu3 %vm632_vm1, %v825_v39 }
 0x2c0   : > { %v2004_v40 = vpop.f32.mrf.mxu3 }
 0x2c4   : > { %v784_v41 = vpop.f32.mrf.mxu1 }
 0x2c5   : > { %v787_v42 = vsel %vm632_vm1, %v784_v41, -inf }
 0x2c6   : > { %788 = vmax.xlane.f32.xlu1 %v787_v42  ;;  %v1361_v42 = vld [vmem:[%s2088_s10 + $0x18] sm:$0xff] }
 0x2c7   : > { %1054 = vmatpush.bf16.msrb.mxu3 %v1361_v42 }
 0x2c8   : > { %v718_v43 = vpop.f32.mrf.mxu3 }
 0x2c9   : > { %v721_v44 = vsel %vm632_vm1, %v718_v43, -inf }
 0x2ca   : > { %722 = vmax.xlane.f32.xlu2 %v721_v44 }
 0x2d0   : > { %v849_v45 = vpop.f32.mrf.mxu3 }
 0x2d1   : > { %v852_v46 = vsel %vm632_vm1, %v849_v45, -inf }
 0x2d2   : > { %853 = vmax.xlane.f32.xlu0 %v852_v46 }
 0x2e6   : > { %863 = vrot.lane.b32.xlu0 %v1991_v22, %s1777_s4  ;;  %s1345_s4 = sshll.u32 %s1863_s21, 3 }
 0x339   : > { %v789_v47 = vpop.xlane.xlu1 %788 }
 0x33a   : > { %v790_v48 = vsub.f32 %v784_v41, %v789_v47  ;;  %v1356_v41 = vld [vmem:[#allocation11] sm:$0xff] }
 0x33c   : > { %v791_v49 = vmul.f32 1.442695, %v790_v48 }
 0x33d   : > { %v723_v50 = vpop.xlane.xlu2 %722 }
 0x33e   : > { %1487 = vpow2.f32 %v791_v49  ;;  %v724_v51 = vsub.f32 %v718_v43, %v723_v50 }
 0x340   : > { %v725_v52 = vmul.f32 1.442695, %v724_v51 }
 0x342   : > { %1489 = vpow2.f32 %v725_v52 }
 0x344   : > { %v1488_v53 = vpop.eup %1487 }
 0x345   : > { %v854_v54 = vpop.xlane.xlu0 %853  ;;  %v793_v55 = vsel %vm632_vm1, %v1488_v53, 0.0 }
 0x346   : > { %v855_v56 = vsub.f32 %v849_v45, %v854_v54  ;;  %794 = vadd.xlane.f32.xlu2 %v793_v55  ;;  %v1360_v45 = vld [vmem:[%s2088_s10 + $0x10] sm:$0xff]  ;;  %v1478_v55 = vld [vmem:[#allocation10 + $0x6] ss:$0 sm:$0xff] }
 0x347   : > { %1055 = vmatpush.bf16.msrb.mxu3 %v1360_v45 }
 0x348   : > { %v856_v57 = vmul.f32 1.442695, %v855_v56  ;;  %v1490_v58 = vpop.eup %1489 }
 0x349   : > { %v727_v59 = vsel %vm632_vm1, %v1490_v58, 0.0 }
 0x34a   : > { %1491 = vpow2.f32 %v856_v57 }
 0x34e   : > { %728 = vadd.xlane.f32.xlu2 %v727_v59 }
 0x350   : > { %v1492_v60 = vpop.eup %1491 }
 0x351   : > { %v858_v61 = vsel %vm632_vm1, %v1492_v60, 0.0 }
 0x352   : > { %859 = vadd.xlane.f32.xlu1 %v858_v61  ;;  %v1358_v61 = vld [vmem:[%s2088_s10] sm:$0xff] }
 0x358   : > { %v864_v4 = vpop.permute.xlu0 %863 }
 0x366   : > { %733 = vrot.lane.b32.xlu2 %v1991_v22, %s1776_s13 }
 0x36b   : > { %798 = vrot.lane.b32.xlu1 %v1991_v22, %s1775_s26  ;;  %s501_s26 = sand.u32 1, %s1755_s18  }
 0x36c   : > { %s1266_s13 = sshll.u32 %s501_s26, 3  ;;  %s1092_s21 = scalar_lea.sflag [#allocation4], %s501_s26 }
 0x36d   : > { %s503_s29 = scalar_lea.vmem [#allocation13], %s1266_s13 }
 0x36e   : > { %s1104_s22 = sshll.u32 %s503_s29, 4  ;;  %s1105_s22 = int_to_ptr.vmem [resolvable:$true] %s1104_s22 }
 0x3b9   : > { %v795_v62 = vpop.xlane.xlu2 %794 }
 0x3c1   : > { %v729_v63 = vpop.xlane.xlu2 %728 }
 0x3c2   : > { %1493 = vrcp.f32 %v729_v63 }
 0x3c5   : > { %v860_v0 = vpop.xlane.xlu1 %859 }
 0x3c6   : > { %1495 = vrcp.f32 %v860_v0 }
 0x3c7   : > { %1497 = vrcp.f32 %v795_v62  ;;  %v1479_v62 = vld [vmem:[%s2087_s9] ss:$0 sm:$0xff] }
 0x3c8   : > { %v1494_v1 = vpop.eup %1493  ;;  %1499 = vrcp.f32 %v1781_v29 }
 0x3c9   : > { %v731_v2 = vmul.f32 %v1494_v1, %v1490_v58  ;;  %v734_v3 = vpop.permute.xlu2 %733 }
 0x3ca   : > { %754 = vmatpush.msra.mxu0 %v734_v3 }
 0x3cb   : > { %1302 = vmatmul.msk.f32.vlgmr.msra.gmra.mxu0 %vm632_vm1, %v731_v2 }
 0x3cc   : > { %884 = vmatpush.msrb.mxu0 %v864_v4  ;;  %v1496_v5 = vpop.eup %1495  ;;  %v1480_v4 = vld [vmem:[#allocation10 + $0x4] ss:$0 sm:$0xff] }
 0x3cd   : > { %v862_v6 = vmul.f32 %v1496_v5, %v1492_v60  ;;  %v1498_v7 = vpop.eup %1497  ;;  %v1359_v60 = vld [vmem:[%s2088_s10 + $0x8] sm:$0xff] }
 0x3ce   : > { %v797_v10 = vmul.f32 %v1498_v7, %v1488_v53  ;;  %v1500_v30 = vpop.eup %1499  ;;  %v1477_v53 = vld [vmem:[#allocation10 + $0x5] ss:$0 sm:$0xff]  ;;  %1056 = vmatpush.bf16.msrb.mxu3 %v1359_v60 }
 0x3cf   : > { %v945_v31 = vmul.f32 32.0, %v1500_v30  ;;  %vm949_vm4 = vweird.f32 %v1500_v30 }
 0x3d1   : > { %v946_v32 = vsub.f32 1.0, %v945_v31 }
 0x3d2   : > { %1057 = vmatpush.bf16.msrb.mxu3 %v1358_v61 }
 0x3d3   : > { %1308 = vmatmul.msk.f32.vlgmr.msrb.gmra.mxu0 %vm632_vm1, %v862_v6  ;;  %v947_v33 = vmul.f32 %v1500_v30, %v946_v32 }
 0x3d5   : > { %v948_v34 = vadd.f32 %v1500_v30, %v947_v33 }
 0x3d7   : > { %v950_v35 = vsel %vm949_vm4, %v1500_v30, %v948_v34 }
 0x3dd   : > { %v799_v9 = vpop.permute.xlu1 %798 }
 0x3de   : > { %819 = vmatpush.msrb.mxu2 %v799_v9 }
 0x3df   : > { %1305 = vmatmul.msk.f32.vlgmr.msrb.gmra.mxu2 %vm632_vm1, %v797_v10 }
 0x448   : > { %v756_v11 = vpop.f32.mrf.mxu0 }
 0x449   : > { %890 = vrot.lane.b32.xlu2 %v756_v11, %s1778_s25 }
 0x450   : > { %v886_v12 = vpop.f32.mrf.mxu0 }
 0x451   : > { %898 = vrot.lane.b32.xlu1 %v886_v12, %s1779_s14 }
 0x462   : > { %v821_v13 = vpop.f32.mrf.mxu2 }
 0x463   : > { %894 = vrot.lane.b32.xlu0 %v821_v13, %s1780_s23  ;;  %s1102_s23 = scalar_lea.hbm %s2089_s11, %s1345_s4 }
 0x464   : > { %s1106_s30 = sshll.u32 %s1102_s23, 4  ;;  %s1107_s30 = int_to_ptr.hbm [resolvable:$true] %s1106_s30 }
 0x465   : > { %s1699_s12 = sshra.s32 %s1107_s30, 4  ;;  %s1700_s12 = int_to_ptr.hbm [resolvable:$true] %s1699_s12 }
 0x466   : > { %s1701_s6 = scalar_lea.hbm %s1700_s12, 8  ;;  %p1706_p3 = scmp.lt.s32.totalorder %s1700_s12, %s2089_s11 }
 0x467   : > { %p1702_p0 = scmp.ne.s32.totalorder %s1700_s12, %s1701_s6  ;;  %p1707_p4 = scmp.lt.s32.totalorder %s1705_s28, %s1701_s6 }
 0x469   : > { %p1703_p1 = pnand %p1702_p0, %p1880_p5  ;;  %p1708_p7 = por %p1707_p4, %p1706_p3 }
 0x46b   : > { %p1704_p2 = pneg %p1703_p1 }
 0x46d   : > { %p1709_p8 = pnand %p1708_p7, %p1704_p2 }
 0x4a3   : > { %v891_v16 = vpop.permute.xlu2 %890 }
 0x4a4   : > { %v901_v17 = vsel %vm632_vm1, %v2004_v40, %v891_v16 }
 0x4c3   : > { %v899_v19 = vpop.permute.xlu1 %898 }
 0x4d5   : > { %v895_v18 = vpop.permute.xlu0 %894 }
 0x4d6   : > { %v903_v20 = vsel %vm902_vm2, %v901_v17, %v895_v18 }
 0x4d7   : > { %v905_v21 = vsel %vm904_vm3, %v903_v20, %v899_v19 }
 0x4d8   : > { %v906_v22 = vpack.c.bf16 %v905_v21, %v905_v21 }
 0x4da   : > { %1317 = vmatmul.msk.bf16.vlgmr.msra.gmra.mxu1 %vm547_vm0, %v906_v22 }
 0x557   : > { %v936_v24 = vpop.f32.mrf.mxu1 }
 0x558   : > { %v937_v25 = vadd.f32 %v1476_v23, %v936_v24 }
 0x55a   : > { %v940_v26 = vadd.f32 %v937_v25, %v1977_v8  ;;  %v1357_v8 = vld [vmem:[#allocation11 + $0x8] sm:$0xff]  ;;  %v1481_v25 = vld [vmem:[#allocation10 + $0x7] ss:$0 sm:$0xff] }
 0x55b   : > { %1004 = vmatpush.bf16.msra.mxu2 %v1357_v8 }
 0x55c   : > { %v941_v27 = vsel %vm547_vm0, %v940_v26, 0.0 }
 0x55d   : > { %942 = vadd.xlane.f32.xlu2 %v941_v27 }
 0x55f   : > { %v938_v28 = vpop.f32.mrf.mxu1  ;;  %1005 = vmatpush.bf16.msra.mxu2 %v1356_v41 }
 0x560   : > { %v1482_v28 = vld [vmem:[#allocation10 + $0x8] ss:$0 sm:$0xff] }
 0x5d0   : > { %v943_v36 = vpop.xlane.xlu2 %942 }
 0x5d1   : > { %v951_v37 = vmul.f32 %v950_v35, %v943_v36 }
 0x5d3   : > { %v952_v38 = vsub.f32 %v940_v26, %v951_v37 }
 0x5d5   : > { %v953_v39 = vmul.f32 %v952_v38, %v952_v38 }
 0x5d7   : > { %v954_v40 = vsel %vm547_vm0, %v953_v39, 0.0 }
 0x5d8   : > { %955 = vadd.xlane.f32.xlu0 %v954_v40 }
 0x64b   : > { %v956_v43 = vpop.xlane.xlu0 %955 }
 0x64c   : > { %v957_v44 = vmul.f32 %v956_v43, %v950_v35 }
 0x64e   : > { %v958_v46 = vadd.f32 1e-05, %v957_v44 }
 0x650   : > { %1501 = vrsqrt.f32 %v958_v46  ;;  %vm965_vm6 = vweird.f32 %v958_v46 }
 0x656   : > { %v1502_v47 = vpop.eup %1501 }
 0x657   : > { %v960_v48 = vmul.f32 %v1502_v47, %v958_v46  ;;  %vm966_vm5 = vweird.f32 %v1502_v47 }
 0x658   : > { %vm967_vm7 = vmor %vm965_vm6, %vm966_vm5 }
 0x659   : > { %v961_v49 = vmul.f32 %v1502_v47, %v960_v48 }
 0x65b   : > { %v962_v50 = vmul.f32 0.5, %v961_v49 }
 0x65d   : > { %v963_v51 = vsub.f32 1.5, %v962_v50 }
 0x65f   : > { %v964_v52 = vmul.f32 %v1502_v47, %v963_v51 }
 0x661   : > { %v968_v54 = vsel %vm967_vm7, %v1502_v47, %v964_v52 }
 0x662   : > { %v969_v56 = vmul.f32 %v968_v54, %v952_v38 }
 0x664   : > { %v971_v57 = vmul.f32 %v1477_v53, %v969_v56 }
 0x666   : > { %v973_v58 = vadd.f32 %v1478_v55, %v971_v57 }
 0x668   : > { %v974_v59 = vpack.c.bf16 %v973_v58, %v973_v58 }
 0x66a   : > { %1326 = vmatmul.msk.bf16.vlgmr.msra.gmra.mxu2 %vm547_vm0, %v974_v59 }
 0x6ed   : > { %v1007_v63 = vpop.f32.mrf.mxu2 }
 0x6ee   : > { %v1008_v0 = vadd.f32 %v1479_v62, %v1007_v63 }
 0x6f0   : > { %v1011_v1 = vmax.f32 %v1008_v0, 0.0 }
 0x6f2   : > { %v1012_v2 = vpack.c.bf16 %v1011_v1, %v1011_v1 }
 0x6f4   : > { %1343 = vmatmul.msk.bf16.vlgmr.msrb.gmra.mxu3 %vm1046_vm8, %v1012_v2 }
 0x6f5   : > { %v1009_v3 = vpop.f32.mrf.mxu2 }
 0x777   : > { %v1059_v5 = vpop.f32.mrf.mxu3 }
 0x778   : > { %v1060_v6 = vadd.f32 %v1480_v4, %v1059_v5 }
 0x77a   : > { %v1063_v7 = vadd.f32 %v1060_v6, %v973_v58 }
 0x77c   : > { %v1064_v9 = vsel %vm547_vm0, %v1063_v7, 0.0 }
 0x77d   : > { %1065 = vadd.xlane.f32.xlu1 %v1064_v9 }
 0x77f   : > { %v1061_v10 = vpop.f32.mrf.mxu3 }
 0x7f0   : > { %v1066_v11 = vpop.xlane.xlu1 %1065 }
 0x7f1   : > { %v1067_v12 = vmul.f32 %v1066_v11, %v950_v35 }
 0x7f3   : > { %v1068_v13 = vsub.f32 %v1063_v7, %v1067_v12 }
 0x7f5   : > { %v1069_v14 = vmul.f32 %v1068_v13, %v1068_v13 }
 0x7f7   : > { %v1070_v15 = vsel %vm547_vm0, %v1069_v14, 0.0 }
 0x7f8   : > { %1071 = vadd.xlane.f32.xlu2 %v1070_v15 }
 0x86b   : > { %v1072_v16 = vpop.xlane.xlu2 %1071 }
 0x86c   : > { %v1073_v17 = vmul.f32 %v1072_v16, %v950_v35 }
 0x86e   : > { %v1074_v18 = vadd.f32 1e-05, %v1073_v17 }
 0x870   : > { %1503 = vrsqrt.f32 %v1074_v18  ;;  %vm1081_vm10 = vweird.f32 %v1074_v18 }
 0x876   : > { %v1504_v19 = vpop.eup %1503 }
 0x877   : > { %v1076_v20 = vmul.f32 %v1504_v19, %v1074_v18  ;;  %vm1082_vm9 = vweird.f32 %v1504_v19 }
 0x878   : > { %vm1083_vm11 = vmor %vm1081_vm10, %vm1082_vm9 }
 0x879   : > { %v1077_v21 = vmul.f32 %v1504_v19, %v1076_v20 }
 0x87b   : > { %v1078_v22 = vmul.f32 0.5, %v1077_v21 }
 0x87d   : > { %v1079_v23 = vsub.f32 1.5, %v1078_v22 }
 0x87f   : > { %v1080_v24 = vmul.f32 %v1504_v19, %v1079_v23 }
 0x881   : > { %v1084_v26 = vsel %vm1083_vm11, %v1504_v19, %v1080_v24 }
 0x882   : > { %v1085_v27 = vmul.f32 %v1084_v26, %v1068_v13 }
 0x884   : > { %v1087_v29 = vmul.f32 %v1481_v25, %v1085_v27 }
 0x886   : > { %v1089_v30 = vadd.f32 %v1482_v28, %v1087_v29 }
 0x888   : > { %1090 = vst.msk [vmem:[%s503_s29] sm:$0xff] %vm547_vm0, %v1089_v30 }
 0x889   : > { %1712 = shalt.err (!%p1709_p8)
}
 0x88a   : > { %1386 = dma.vmem_to_hbm [thread:$0]  (%p1880_p5), %s1105_s22, 128, %s1107_s30, %s1092_s21  }
 0x88b PF: > { %p1423_p9 = scmp.ge.s32.totalorder %s1763_s20, 2  ;;  %s1118_s13 = sand.u32 1, %s1751_s17  }
 0x88c   : > { %s1119_s4 = scalar_lea.sflag [#allocation4], %s1118_s13 }
 0x88d   : > { %p1408_p10 = pnand %p1423_p9, %p1884_p6 }
 0x88f   : > { %p1409_p11 = pneg %p1408_p10 }
 0x891   : > { %1746 = dma.done.wait (%p1409_p11), %s1119_s4, 128  }
 0x892   : > { %1748 = vsyncadd (%p1409_p11), %s1119_s4, 4294967168  ;;  %s2107_s20 = sld [smem:[#allocation20_spill]]  ;;  %s2110_s17 = smov %s1755_s18 }
 0x893   : > { %s2108_s25 = sld [smem:[#allocation19_spill]] }
 0x894   : > { %s2109_s19 = sld [smem:[#allocation21_spill]] }
 0x898   : > { %p25_p12 = scmp.ge.s32.totalorder %s2107_s20, 4  }
 0x899   : > { %s2111_s18 = smov %s2108_s25 }
 0x89a   :  { %27 = sbr.rel (!%p25_p12) target bundleno = 10 (0xa), region = 130 }
 0x89f   :  { %1125 = vsyncpa [#allocation3], 1 }
 0x8a0   :  { %1127 = vsyncpa [#allocation3 + $0x1], 1 }
 0x8a1   :  { %1128 = vsyncpa [#allocation6], 1 }
 0x8a2   :  { %1129 = vsyncpa [#allocation9], 1 }
 0x8a3   :  { %1130 = vsyncpa [#allocation12], 1 }
 0x8a4   :  { %1131 = vsyncpa [#allocation4], 1 }
 0x8a5   :  { %1133 = vsyncpa [#allocation4 + $0x1], 1 }

</bundles_post_ra>
